<compile_context>
chip_gen: v6e
topology: v6e:2x2x1
jax: 0.10.0
libtpu: 0.0.40
codegen_flags: <defaults>
</compile_context>

<pallas_src>
import jax
import jax.numpy as jnp
from jax.experimental import pallas as pl
from jax.experimental.pallas import tpu as pltpu

_LANE = 128                        # vreg lane width: last dim should be 128*k
_MXU_M = 256                       # MXU M granularity on v6e/v7x (sublane-safe)
_VMEM_BUDGET = 40 * 1024 * 1024    # working-set target; fits v7x's 64 MiB VMEM
_VMEM_CAP = 48 * 1024 * 1024       # scoped-VMEM ceiling safe on every generation
_VMEM_FLOOR = 32 * 1024 * 1024


def _round_up(n, m):
    return ((n + m - 1) // m) * m


def se_kernel(x_ref, w1_ref, w2_ref, xy_ref, y_ref):
    x = x_ref[...]                                   # (TB, C), input dtype
    # fc[0]: Linear(C, C//r, bias=False)  +  fc[1]: ReLU   (MXU, f32 accum)
    h = jnp.maximum(
        jnp.dot(x, w1_ref[...], preferred_element_type=jnp.float32), 0.0)
    # fc[2]: Linear(C//r, C, bias=False)  +  fc[3]: Sigmoid
    # (for bf16 inputs h is rounded to bf16 before the second matmul, matching
    #  the PyTorch bf16 MXU path; exact f32 when inputs are f32.)
    logits = jnp.dot(h.astype(x_ref.dtype), w2_ref[...],
                     preferred_element_type=jnp.float32)
    y = jax.nn.sigmoid(logits)                       # f32 EUP path
    y_ref[...] = y.astype(y_ref.dtype)
    if jnp.dtype(x_ref.dtype) == jnp.dtype(jnp.float32):
        xy_ref[...] = x * y                          # f32 scale
    else:
        # bf16 VALU on v6e/v7x: scale in the input dtype (halves VPU traffic).
        xy_ref[...] = (x * y.astype(x_ref.dtype)).astype(xy_ref.dtype)


def _choose_tile(B, C, hidden, itemsize):
    """Pick the batch tile; return (tb, working-set estimate in bytes)."""
    w_bytes = 2 * C * hidden * itemsize              # W1+W2, single-buffered

    def working_set(tb):
        streams = 2 * 3 * tb * C * itemsize          # x + 2 outs, double-buffered
        temps = 2 * tb * C * 4 + tb * hidden * 4     # f32 y, f32 xy, f32 h
        return streams + temps + w_bytes

    if B <= 2 * _MXU_M:                              # small batch: one full block
        return B, working_set(B)

    # Mem-bound sweet spot is ~512-1024 rows; shrink until it fits the budget.
    tb = 4 * _MXU_M
    while tb > _MXU_M and working_set(tb) > _VMEM_BUDGET:
        tb -= _MXU_M
    # Guarantee >= 4 grid steps for large B: keeps the pipeline's double
    # buffering engaged and lets v7x shard the batch axis across both TCs.
    if B >= 4 * _MXU_M:
        tb = min(tb, _round_up(pl.cdiv(B, 4), _MXU_M))
    tb = min(tb, B)
    return tb, working_set(tb)


def se_layer(x, w1, w2):
    """x: [B, C], w1: [C, C//r], w2: [C//r, C] -> (x*y, y), both [B, C]."""
    B, C = x.shape
    hidden = w1.shape[1]

    # Pad the channel dim to a lane multiple: ragged last dims lower to masked
    # partial stores (vst.msk), measured up to ~4.5x slower on the store path.
    Cp = _round_up(C, _LANE)
    if Cp != C:
        x = jnp.pad(x, ((0, 0), (0, Cp - C)))
        w1 = jnp.pad(w1, ((0, Cp - C), (0, 0)))
        w2 = jnp.pad(w2, ((0, 0), (0, Cp - C)))

    itemsize = jnp.dtype(x.dtype).itemsize
    tb, est = _choose_tile(B, Cp, hidden, itemsize)
    grid = (pl.cdiv(B, tb),)
    # Scoped-VMEM limit: never below the working-set estimate (+25% headroom),
    # clamped to a ceiling that is safe on v7x's 64 MiB physical VMEM.
    vmem_limit = min(_VMEM_CAP, max(_VMEM_FLOOR, int(1.25 * est)))

    out_shapes = (
        jax.ShapeDtypeStruct((B, Cp), x.dtype),  # x * y
        jax.ShapeDtypeStruct((B, Cp), x.dtype),  # y
    )
    xy, y = pl.pallas_call(
        se_kernel,
        out_shape=out_shapes,
        grid=grid,
        in_specs=[
            pl.BlockSpec((tb, Cp), lambda i: (i, 0)),       # x: batch-tiled stream
            # Weights: constant index_map -> fetched once; single-buffer them so
            # the second buffer's VMEM goes to the streamed tiles instead.
            pl.BlockSpec((Cp, hidden), lambda i: (0, 0),
                         pipeline_mode=pl.Buffered(1)),
            pl.BlockSpec((hidden, Cp), lambda i: (0, 0),
                         pipeline_mode=pl.Buffered(1)),
        ],
        out_specs=(
            pl.BlockSpec((tb, Cp), lambda i: (i, 0)),       # x * y
            pl.BlockSpec((tb, Cp), lambda i: (i, 0)),       # y
        ),
        compiler_params=pltpu.CompilerParams(
            dimension_semantics=("parallel",),              # 2 TCs on v7x
            vmem_limit_bytes=int(vmem_limit),
        ),
    )(x, w1, w2)

    if Cp != C:
        xy, y = xy[:, :C], y[:, :C]
    return xy, y


def init_params(key, channel, reduction):
    """Deterministic init mimicking nn.Linear (kaiming-uniform-ish, no bias).

    PyTorch stores Linear weight as [out, in] and computes x @ W.T; here we
    directly build W1 = fc0.weight.T ([C, C//r]) and W2 = fc2.weight.T
    ([C//r, C]) so the kernel does plain row-major matmuls.
    """
    hidden = channel // reduction
    k1, k2 = jax.random.split(key)
    bound1 = 1.0 / (channel ** 0.5)   # fan_in = channel for fc0
    bound2 = 1.0 / (hidden ** 0.5)    # fan_in = hidden  for fc2
    w1 = jax.random.uniform(k1, (channel, hidden), jnp.float32, -bound1, bound1)
    w2 = jax.random.uniform(k2, (hidden, channel), jnp.float32, -bound2, bound2)
    return w1, w2


def _check(x, w1, w2, atol=1e-5, rtol=1e-5):
    xy, y = se_layer(x, w1, w2)
    jax.block_until_ready((xy, y))
    y_ref = jax.nn.sigmoid(jnp.maximum(x @ w1, 0.0) @ w2)
    xy_ref = x * y_ref
    assert jnp.allclose(y, y_ref, atol=atol, rtol=rtol)
    assert jnp.allclose(xy, xy_ref, atol=atol, rtol=rtol)


if __name__ == "__main__":
    # TODO(synk): at these tiny sizes per-call overhead dominates; in a real
    # model the SE scale should be fused into the surrounding MLP kernel so x
    # is never re-read from HBM and x*y never re-written.
    key = jax.random.PRNGKey(0)
    kx1, kp1, kx2, kp2 = jax.random.split(key, 4)

    # Case 1: channel already a lane multiple (C=128, r=16 -> hidden=8).
    B1, C1, R1 = 8, 128, 16
    x1 = jax.random.normal(kx1, (B1, C1), jnp.float32)
    w1a, w2a = init_params(kp1, C1, R1)
    _check(x1, w1a, w2a)

    # Case 2: ragged channel dim (C=96 -> padded to 128 inside the wrapper).
    B2, C2, R2 = 8, 96, 4
    x2 = jax.random.normal(kx2, (B2, C2), jnp.float32)
    w1b, w2b = init_params(kp2, C2, R2)
    _check(x2, w1b, w2b)

    print("KERNEL_OK")
</pallas_src>

<mosaic_0001>
module attributes {stable_mosaic.version = 11 : i64} {
  func.func @se_kernel(%arg0: i32, %arg1: memref<8x128xf32, #tpu.memory_space<vmem>>, %arg2: memref<128x8xf32, #tpu.memory_space<vmem>>, %arg3: memref<8x128xf32, #tpu.memory_space<vmem>>, %arg4: memref<8x128xf32, #tpu.memory_space<vmem>>, %arg5: memref<8x128xf32, #tpu.memory_space<vmem>>) attributes {dimension_semantics = [#tpu.dimension_semantics<parallel>], iteration_bounds = array<i64: 1>, scalar_prefetch = 0 : i64, scratch_operands = 0 : i64, tpu.core_type = #tpu.core_type<tc>, window_params = [{transform_indices = @transform_0, window_bounds = array<i64: 8, 128>}, {pipeline_mode = #tpu.pipeline_mode<synchronous>, transform_indices = @transform_1, window_bounds = array<i64: 128, 8>}, {pipeline_mode = #tpu.pipeline_mode<synchronous>, transform_indices = @transform_2, window_bounds = array<i64: 8, 128>}, {transform_indices = @transform_3, window_bounds = array<i64: 8, 128>}, {transform_indices = @transform_4, window_bounds = array<i64: 8, 128>}]} {
    %c0 = arith.constant 0 : index
    %c0_0 = arith.constant 0 : index
    %0 = vector.load %arg1[%c0, %c0_0] : memref<8x128xf32, #tpu.memory_space<vmem>>, vector<8x128xf32>
    %c0_1 = arith.constant 0 : index
    %c0_2 = arith.constant 0 : index
    %1 = vector.load %arg2[%c0_1, %c0_2] : memref<128x8xf32, #tpu.memory_space<vmem>>, vector<128x8xf32>
    %cst = arith.constant dense<0.000000e+00> : vector<8x8xf32>
    %2 = tpu.matmul %0, %1, %cst {dimension_numbers = #tpu.dot_dimension_numbers<[1], [0], [0], [1], [0, 0, 1, 1], [], []>} : vector<8x128xf32>, vector<128x8xf32>, vector<8x8xf32> -> vector<8x8xf32>
    %cst_3 = arith.constant 0.000000e+00 : f32
    %3 = vector.broadcast %cst_3 : f32 to vector<8x8xf32>
    %4 = arith.maximumf %2, %3 : vector<8x8xf32>
    %c0_4 = arith.constant 0 : index
    %c0_5 = arith.constant 0 : index
    %5 = vector.load %arg3[%c0_4, %c0_5] : memref<8x128xf32, #tpu.memory_space<vmem>>, vector<8x128xf32>
    %cst_6 = arith.constant dense<0.000000e+00> : vector<8x128xf32>
    %6 = tpu.matmul %4, %5, %cst_6 {dimension_numbers = #tpu.dot_dimension_numbers<[1], [0], [0], [1], [0, 0, 1, 1], [], []>} : vector<8x8xf32>, vector<8x128xf32>, vector<8x128xf32> -> vector<8x128xf32>
    %7 = arith.negf %6 : vector<8x128xf32>
    %8 = math.exp %7 : vector<8x128xf32>
    %cst_7 = arith.constant 1.000000e+00 : f32
    %9 = vector.broadcast %cst_7 : f32 to vector<8x128xf32>
    %10 = arith.addf %9, %8 : vector<8x128xf32>
    %11 = arith.divf %9, %10 : vector<8x128xf32>
    %c0_8 = arith.constant 0 : index
    %c0_9 = arith.constant 0 : index
    %12 = vector.load %arg5[%c0_8, %c0_9] : memref<8x128xf32, #tpu.memory_space<vmem>>, vector<8x128xf32>
    tpu.vector_store %arg5[%c0_8, %c0_9], %11 {strides = array<i32>} : memref<8x128xf32, #tpu.memory_space<vmem>>, vector<8x128xf32>,
    %13 = arith.mulf %0, %11 : vector<8x128xf32>
    %c0_10 = arith.constant 0 : index
    %c0_11 = arith.constant 0 : index
    %14 = vector.load %arg4[%c0_10, %c0_11] : memref<8x128xf32, #tpu.memory_space<vmem>>, vector<8x128xf32>
    tpu.vector_store %arg4[%c0_10, %c0_11], %13 {strides = array<i32>} : memref<8x128xf32, #tpu.memory_space<vmem>>, vector<8x128xf32>,
    return
  }
  func.func @transform_0(%arg0: i32) -> (i32, i32) {
    %c0_i32 = arith.constant 0 : i32
    %c0_i32_0 = arith.constant 0 : i32
    return %arg0, %c0_i32 : i32, i32
  }
  func.func @transform_1(%arg0: i32) -> (i32, i32) {
    %c0_i32 = arith.constant 0 : i32
    %c0_i32_0 = arith.constant 0 : i32
    %c0_i32_1 = arith.constant 0 : i32
    return %c0_i32, %c0_i32_0 : i32, i32
  }
  func.func @transform_2(%arg0: i32) -> (i32, i32) {
    %c0_i32 = arith.constant 0 : i32
    %c0_i32_0 = arith.constant 0 : i32
    %c0_i32_1 = arith.constant 0 : i32
    return %c0_i32, %c0_i32_0 : i32, i32
  }
  func.func @transform_3(%arg0: i32) -> (i32, i32) {
    %c0_i32 = arith.constant 0 : i32
    %c0_i32_0 = arith.constant 0 : i32
    return %arg0, %c0_i32 : i32, i32
  }
  func.func @transform_4(%arg0: i32) -> (i32, i32) {
    %c0_i32 = arith.constant 0 : i32
    %c0_i32_0 = arith.constant 0 : i32
    return %arg0, %c0_i32 : i32, i32
  }
}

</mosaic_0001>

<bundles_post_ra>
// kernel: tpu_custom_call.1
= control target key start
LH: loop header
LB: loop body
LE: loop exit
PB: predicated region body
PF: predicated region fallthrough
CT: control target
= control target key end

     0   :  { %10 = vsyncpa [#allocation3], 0  ;;  %v331_v1 = vmov 0.0   ;;  %vm332_vm0 = vmmov 0   ;;  %s420_s0 = inlined_call_operand.vmem [shape: f32[8,128], index: 0, kind: input, shape index: {}]   ;;  %s421_s1 = inlined_call_operand.vmem [shape: f32[128,8], index: 1, kind: input, shape index: {}]   ;;  %s422_s2 = inlined_call_operand.vmem [shape: f32[8,128], index: 2, kind: input, shape index: {}]   ;;  %s423_s3 = inlined_call_operand.hbm [shape: f32[8,128], index: 3, kind: output, shape index: {0}]   ;;  %s424_s4 = inlined_call_operand.hbm [shape: f32[8,128], index: 4, kind: output, shape index: {1}]  }
   0x1   :  { %v34_v0 = vld [vmem:[%s421_s1 + $0x78] sm:$0xff]  ;;  %239 = vmatprep.subr.mxu0 %v331_v1  ;;  %v33_v2 = vld [vmem:[%s421_s1 + $0x70] sm:$0xff]  ;;  %271 = vmatprep.mubr.msk.f32.mxu0 %vm332_vm0, %v331_v1  ;;  %v32_v3 = vld [vmem:[%s421_s1 + $0x68] sm:$0xff] }
   0x2   :  { %240 = vmatpush3.msra.mxu0 %v34_v0  ;;  %274 = vmatprep.subr.mxu1 %v331_v1  ;;  %v31_v4 = vld [vmem:[%s421_s1 + $0x60] sm:$0xff] }
   0x3   :  { %241 = vmatprep.subr.mxu0 %v331_v1  ;;  %276 = vmatprep.mubr.msk.f32.mxu1 %vm332_vm0, %v331_v1 }
   0x4   :  { %242 = vmatpush3.msra.mxu0 %v33_v2 }
   0x5   :  { %243 = vmatprep.subr.mxu0 %v331_v1 }
   0x6   :  { %11 = vsyncpa [#allocation5], 0  ;;  %244 = vmatpush3.msra.mxu0 %v32_v3  ;;  %v30_v5 = vld [vmem:[%s421_s1 + $0x58] sm:$0xff]  ;;  %v29_v6 = vld [vmem:[%s421_s1 + $0x50] sm:$0xff]  ;;  %vm107_vm1 = vcmask 64512   ;;  %s334_s25 = smov [#allocation2]  }
   0x7   :  { %245 = vmatprep.subr.mxu0 %v331_v1  ;;  %v28_v7 = vld [vmem:[%s421_s1 + $0x48] sm:$0xff]  ;;  %v27_v8 = vld [vmem:[%s421_s1 + $0x40] sm:$0xff]  ;;  %v26_v9 = vld [vmem:[%s421_s1 + $0x38] sm:$0xff]  ;;  %s196_s26 = sshll.u32 %s334_s25, 4  ;;  %s197_s26 = int_to_ptr.vmem [resolvable:$true] %s196_s26 }
   0x8   :  { %246 = vmatpush3.msra.mxu0 %v31_v4  ;;  %v25_v10 = vld [vmem:[%s421_s1 + $0x30] sm:$0xff]  ;;  %v24_v11 = vld [vmem:[%s421_s1 + $0x28] sm:$0xff]  ;;  %v23_v12 = vld [vmem:[%s421_s1 + $0x20] sm:$0xff] }
   0x9   :  { %247 = vmatprep.subr.mxu0 %v331_v1  ;;  %v22_v13 = vld [vmem:[%s421_s1 + $0x18] sm:$0xff]  ;;  %v21_v14 = vld [vmem:[%s421_s1 + $0x10] sm:$0xff]  ;;  %v20_v15 = vld [vmem:[%s421_s1 + $0x8] sm:$0xff] }
   0xa   :  { %248 = vmatpush3.msra.mxu0 %v30_v5  ;;  %v19_v16 = vld [vmem:[%s421_s1] sm:$0xff] }
   0xb   :  { %249 = vmatprep.subr.mxu0 %v331_v1  ;;  %v18_v17 = vld [vmem:[%s420_s0] sm:$0xff]  ;;  %s333_s0 = smov [#allocation4]  }
   0xc   :  { %250 = vmatpush3.msra.mxu0 %v29_v6  ;;  %v106_v18 = vld [vmem:[%s422_s2] sm:$0xff]  ;;  %s206_s1 = sshll.u32 %s333_s0, 4  ;;  %s207_s1 = int_to_ptr.vmem [resolvable:$true] %s206_s1 }
   0xd   :  { %251 = vmatprep.subr.mxu0 %v331_v1  ;;  %275 = vmatpush3.msra.mxu1 %v106_v18  ;;  %s287_s2 = scalar_lea.vmem %s207_s1, 128  ;;  %p292_p1 = scmp.lt.s32.totalorder %s207_s1, %s207_s1 }
   0xe   :  { %252 = vmatpush3.msra.mxu0 %v28_v7  ;;  %p288_p0 = scmp.ne.s32.totalorder %s207_s1, %s287_s2  ;;  %p293_p2 = scmp.lt.s32.totalorder %s287_s2, %s287_s2 }
   0xf   :  { %253 = vmatprep.subr.mxu0 %v331_v1 }
  0x10   :  { %254 = vmatpush3.msra.mxu0 %v27_v8  ;;  %p294_p3 = por %p293_p2, %p292_p1 }
  0x11   :  { %255 = vmatprep.subr.mxu0 %v331_v1 }
  0x12   :  { %256 = vmatpush3.msra.mxu0 %v26_v9  ;;  %p295_p4 = pnand %p294_p3, %p288_p0 }
  0x13   :  { %257 = vmatprep.subr.mxu0 %v331_v1 }
  0x14   :  { %258 = vmatpush3.msra.mxu0 %v25_v10 }
  0x15   :  { %259 = vmatprep.subr.mxu0 %v331_v1 }
  0x16   :  { %260 = vmatpush3.msra.mxu0 %v24_v11 }
  0x17   :  { %261 = vmatprep.subr.mxu0 %v331_v1 }
  0x18   :  { %262 = vmatpush3.msra.mxu0 %v23_v12 }
  0x19   :  { %263 = vmatprep.subr.mxu0 %v331_v1 }
  0x1a   :  { %264 = vmatpush3.msra.mxu0 %v22_v13 }
  0x1b   :  { %265 = vmatprep.subr.mxu0 %v331_v1 }
  0x1c   :  { %266 = vmatpush3.msra.mxu0 %v21_v14 }
  0x1d   :  { %267 = vmatprep.subr.mxu0 %v331_v1 }
  0x1e   :  { %268 = vmatpush3.msra.mxu0 %v20_v15 }
  0x1f   :  { %269 = vmatprep.subr.mxu0 %v331_v1 }
  0x20   :  { %270 = vmatpush3.msra.mxu0 %v19_v16 }
  0x21   :  { %272 = vmatmul.mubr.f32.vlgmr.msra.gmra.mxu0 %v18_v17 }
  0xe1   :  { %v101_v19 = vpop.f32.mrf.mxu0 }
  0xe2   :  { %v105_v20 = vmax.f32 %v101_v19, 0.0 }
  0xe3   :  { %v273_v21 = vpop.f32.mrf.mxu0 }
  0xe4   :  { %277 = vmatmul.mubr.msk.f32.vlgmr.msra.gmra.mxu1 %vm107_vm1, %v105_v20 }
 0x1a4   :  { %v177_v22 = vpop.f32.mrf.mxu1 }
 0x1a5   :  { %v219_v23 = vmul.f32 -1.442695, %v177_v22 }
 0x1a6   :  { %v278_v24 = vpop.f32.mrf.mxu1 }
 0x1a7   :  { %283 = vpow2.f32 %v219_v23 }
 0x1b4   :  { %v284_v25 = vpop.eup %283 }
 0x1b5   :  { %v184_v26 = vadd.f32 1.0, %v284_v25 }
 0x1b7   :  { %285 = vrcp.f32 %v184_v26 }
 0x1c4   :  { %v286_v27 = vpop.eup %285 }
 0x1c5   :  { %187 = vst [vmem:[#allocation4] sm:$0xff] %v286_v27  ;;  %v188_v28 = vmul.f32 %v286_v27, %v18_v17 }
 0x1c6   :  { %298 = shalt.err (!%p295_p4)
}
 0x1c7   :  { %209 = dma.vmem_to_hbm [thread:$0]  %s207_s1, 128, %s424_s4, [#allocation5]   ;;  %189 = vst [vmem:[#allocation2] sm:$0xff] %v188_v28 }
 0x1c8   :  { %s307_s29 = scalar_lea.vmem %s197_s26, 128  ;;  %p312_p6 = scmp.lt.s32.totalorder %s197_s26, %s197_s26 }
 0x1c9   :  { %p308_p5 = scmp.ne.s32.totalorder %s197_s26, %s307_s29  ;;  %p313_p7 = scmp.lt.s32.totalorder %s307_s29, %s307_s29 }
 0x1cb   :  { %p314_p8 = por %p313_p7, %p312_p6 }
 0x1cd   :  { %p315_p9 = pnand %p314_p8, %p308_p5 }
 0x1cf   :  { %318 = shalt.err (!%p315_p9)
}
 0x1d0   :  { %199 = dma.vmem_to_hbm [thread:$0]  %s197_s26, 128, %s423_s3, [#allocation3]  }
 0x1d1   :  { %327 = dma.done.wait [#allocation3], 128  }
 0x1d2   :  { %328 = vsyncadd [#allocation3], 4294967168 }
 0x1d3   :  { %329 = dma.done.wait [#allocation5], 128  }
 0x1d4   :  { %330 = vsyncadd [#allocation5], 4294967168 }
 0x1d5   :  { %216 = vsyncpa [#allocation3], 1 }
 0x1d6   :  { %217 = vsyncpa [#allocation5], 1 }

</bundles_post_ra>
